<compile_context>
chip_gen: v7x
topology: tpu7x:2x2x1
jax: 0.10.0
libtpu: 0.0.40
codegen_flags: <defaults>
</compile_context>

<pallas_src>
import math

import jax
import jax.numpy as jnp
import numpy as np
from jax.experimental import pallas as pl
from jax.experimental.pallas import tpu as pltpu


def primary_cap_kernel(p_ref, w1_ref, b1_ref, w2_ref, b2_ref, o_ref):
    # p_ref : (TM, 9*Cin)    im2col patches, one row per output pixel
    # w1_ref: (9*Cin, Ctot)  3x3 conv weights flattened (tap-major, chan-minor)
    # b1_ref: (1, Ctot)
    # w2_ref: (Ctot, Ctot)   block-diagonal CapsAct weights (in-dim x out-dim)
    # b2_ref: (1, Ctot)
    # o_ref : (TM, Ctot)
    acc = jnp.dot(p_ref[...], w1_ref[...], preferred_element_type=jnp.float32)
    acc = jnp.maximum(acc + b1_ref[...], 0.0)                  # bias + ReLU
    out = jnp.dot(acc, w2_ref[...], preferred_element_type=jnp.float32)
    o_ref[...] = (out + b2_ref[...]).astype(o_ref.dtype)       # single store


def primary_cap_forward(x_nchw, convW_1, bias_1, capsact_W, capsact_B,
                        n_channels, dim_capsule, stride=1):
    B, Cin, H, W = x_nchw.shape
    NC, DC = n_channels, dim_capsule
    Ctot = NC * DC
    assert convW_1.shape == (Ctot, Cin, 3, 3)
    assert capsact_W.shape == (Ctot, DC, 1, 1)

    # conv output spatial extents (k=3, pad=1, stride=s)
    Ho = (H + 2 - 3) // stride + 1
    Wo = (W + 2 - 3) // stride + 1
    K = 9 * Cin

    # ---- wrapper-side glue (pure XLA, traced once) ----
    # NCHW -> NHWC, zero pad (padding=1 on H and W)
    x = jnp.transpose(x_nchw, (0, 2, 3, 1))
    xpad = jnp.pad(x, ((0, 0), (1, 1), (1, 1), (0, 0)))

    # im2col with strided tap extraction (stride=2 directly costs 1/4 the work)
    taps = []
    for dy in range(3):
        for dx in range(3):
            taps.append(xpad[:, dy:dy + stride * (Ho - 1) + 1:stride,
                             dx:dx + stride * (Wo - 1) + 1:stride, :])
    patches = jnp.concatenate(taps, axis=-1).reshape(B * Ho * Wo, K)

    # 3x3 weights: (Ctot, Cin, ky, kx) -> (ky, kx, Cin, Ctot) -> (9*Cin, Ctot)
    w1 = jnp.transpose(convW_1, (2, 3, 1, 0)).reshape(K, Ctot)
    b1 = bias_1.reshape(1, Ctot)

    # CapsAct weights -> block-diagonal (Ctot, Ctot), in-dim rows x out-dim cols
    w2_sq = capsact_W[:, :, 0, 0].reshape(NC, DC, DC)          # (g, out, in)
    w2_t = jnp.transpose(w2_sq, (0, 2, 1))                     # (g, in, out)
    eye = jnp.eye(NC, dtype=w2_t.dtype)
    blk = w2_t[:, None, :, :] * eye[:, :, None, None]          # (g, h, in, out)
    w2_bd = jnp.transpose(blk, (0, 2, 1, 3)).reshape(Ctot, Ctot)
    b2 = capsact_B.reshape(1, Ctot)

    # ---- tiling over all output pixels ----
    M = B * Ho * Wo
    TM = 512 if M >= 512 else ((M + 7) // 8) * 8               # large row tiles
    Mpad = pl.cdiv(M, TM) * TM
    if Mpad != M:
        patches = jnp.pad(patches, ((0, Mpad - M), (0, 0)))

    out = pl.pallas_call(
        primary_cap_kernel,
        out_shape=jax.ShapeDtypeStruct((Mpad, Ctot), jnp.float32),
        grid_spec=pltpu.PrefetchScalarGridSpec(
            num_scalar_prefetch=0,
            grid=(Mpad // TM,),
            in_specs=[
                pl.BlockSpec((TM, K), lambda i: (i, 0)),
                pl.BlockSpec((K, Ctot), lambda i: (0, 0)),
                pl.BlockSpec((1, Ctot), lambda i: (0, 0)),
                pl.BlockSpec((Ctot, Ctot), lambda i: (0, 0)),
                pl.BlockSpec((1, Ctot), lambda i: (0, 0)),
            ],
            out_specs=pl.BlockSpec((TM, Ctot), lambda i: (i, 0)),
        ),
        compiler_params=pltpu.CompilerParams(
            dimension_semantics=("parallel",)),
    )(patches, w1, b1, w2_bd, b2)

    out = out[:M].reshape(B, Ho, Wo, NC, DC)
    out = jnp.transpose(out, (0, 3, 4, 1, 2))                  # (B, NC, DC, H', W')
    return out


def reference_forward(x_nchw, convW_1, bias_1, capsact_W, capsact_B,
                      n_channels, dim_capsule, stride=1):
    """Plain-JAX replica of the PyTorch forward (for verification)."""
    y = jax.lax.conv_general_dilated(
        x_nchw, convW_1, window_strides=(stride, stride),
        padding=((1, 1), (1, 1)),
        dimension_numbers=('NCHW', 'OIHW', 'NCHW'))
    y = jax.nn.relu(y + bias_1[None, :, None, None])
    DC = dim_capsule
    outs = []
    for c in range(n_channels):
        chunk = y[:, c * DC:(c + 1) * DC]                       # (B, DC_in, H', W')
        wc = capsact_W[c * DC:(c + 1) * DC, :, 0, 0]            # (DC_out, DC_in)
        bc = capsact_B[c * DC:(c + 1) * DC]
        oc = jnp.einsum('bihw,ji->bjhw', chunk, wc) + bc[None, :, None, None]
        outs.append(oc[:, None])
    return jnp.concatenate(outs, axis=1)                        # (B, NC, DC, H', W')


if __name__ == "__main__":
    B, Cin, H, W = 2, 4, 16, 16
    n_channels, dim_capsule = 4, 8
    Ctot = n_channels * dim_capsule

    key = jax.random.PRNGKey(0)
    k1, k2, k3, k4, k5 = jax.random.split(key, 5)

    gain = math.sqrt(2.0)  # nn.init.calculate_gain('relu')
    # convW_1: xavier_uniform over (Ctot, Cin, 3, 3)
    bnd1 = gain * math.sqrt(6.0 / (Cin * 9 + Ctot * 9))
    convW_1 = jax.random.uniform(k1, (Ctot, Cin, 3, 3), jnp.float32, -bnd1, bnd1)
    # CapsAct_W: xavier_uniform over (Ctot, DC, 1, 1)
    bnd2 = gain * math.sqrt(6.0 / (dim_capsule + Ctot))
    capsact_W = jax.random.uniform(k2, (Ctot, dim_capsule, 1, 1), jnp.float32,
                                   -bnd2, bnd2)
    # module initializes biases to zero; use small nonzero values here to
    # actually exercise the bias-add path in the kernel
    bias_1 = 0.01 * jax.random.normal(k3, (Ctot,), jnp.float32)
    capsact_B = 0.01 * jax.random.normal(k4, (Ctot,), jnp.float32)

    x = jax.random.normal(k5, (B, Cin, H, W), jnp.float32)

    # decrease_resolution=False (stride=1)
    out1 = primary_cap_forward(x, convW_1, bias_1, capsact_W, capsact_B,
                               n_channels, dim_capsule, stride=1)
    out1 = jax.block_until_ready(out1)
    assert out1.shape == (B, n_channels, dim_capsule, H, W), out1.shape
    ref1 = reference_forward(x, convW_1, bias_1, capsact_W, capsact_B,
                             n_channels, dim_capsule, stride=1)
    np.testing.assert_allclose(np.asarray(out1), np.asarray(ref1),
                               rtol=1e-4, atol=1e-4)

    # decrease_resolution=True (stride=2)
    out2 = primary_cap_forward(x, convW_1, bias_1, capsact_W, capsact_B,
                               n_channels, dim_capsule, stride=2)
    out2 = jax.block_until_ready(out2)
    assert out2.shape == (B, n_channels, dim_capsule, H // 2, W // 2), out2.shape
    ref2 = reference_forward(x, convW_1, bias_1, capsact_W, capsact_B,
                             n_channels, dim_capsule, stride=2)
    np.testing.assert_allclose(np.asarray(out2), np.asarray(ref2),
                               rtol=1e-4, atol=1e-4)

    print("KERNEL_OK")
</pallas_src>

<mosaic_0001>
module attributes {stable_mosaic.version = 11 : i64} {
  func.func @primary_cap_kernel(%arg0: i32, %arg1: memref<512x36xf32, #tpu.memory_space<vmem>>, %arg2: memref<36x32xf32, #tpu.memory_space<vmem>>, %arg3: memref<1x32xf32, #tpu.memory_space<vmem>>, %arg4: memref<32x32xf32, #tpu.memory_space<vmem>>, %arg5: memref<1x32xf32, #tpu.memory_space<vmem>>, %arg6: memref<512x32xf32, #tpu.memory_space<vmem>>) attributes {dimension_semantics = [#tpu.dimension_semantics<parallel>], iteration_bounds = array<i64: 1>, scalar_prefetch = 0 : i64, scratch_operands = 0 : i64, tpu.core_type = #tpu.core_type<tc>, window_params = [{transform_indices = @transform_0, window_bounds = array<i64: 512, 36>}, {pipeline_mode = #tpu.pipeline_mode<synchronous>, transform_indices = @transform_1, window_bounds = array<i64: 36, 32>}, {pipeline_mode = #tpu.pipeline_mode<synchronous>, transform_indices = @transform_2, window_bounds = array<i64: 1, 32>}, {pipeline_mode = #tpu.pipeline_mode<synchronous>, transform_indices = @transform_3, window_bounds = array<i64: 32, 32>}, {pipeline_mode = #tpu.pipeline_mode<synchronous>, transform_indices = @transform_4, window_bounds = array<i64: 1, 32>}, {transform_indices = @transform_5, window_bounds = array<i64: 512, 32>}]} {
    %c0 = arith.constant 0 : index
    %c0_0 = arith.constant 0 : index
    %0 = vector.load %arg1[%c0, %c0_0] : memref<512x36xf32, #tpu.memory_space<vmem>>, vector<512x36xf32>
    %c0_1 = arith.constant 0 : index
    %c0_2 = arith.constant 0 : index
    %1 = vector.load %arg2[%c0_1, %c0_2] : memref<36x32xf32, #tpu.memory_space<vmem>>, vector<36x32xf32>
    %cst = arith.constant dense<0.000000e+00> : vector<512x32xf32>
    %2 = tpu.matmul %0, %1, %cst {dimension_numbers = #tpu.dot_dimension_numbers<[1], [0], [0], [1], [0, 0, 1, 1], [], []>} : vector<512x36xf32>, vector<36x32xf32>, vector<512x32xf32> -> vector<512x32xf32>
    %c0_3 = arith.constant 0 : index
    %c0_4 = arith.constant 0 : index
    %3 = vector.load %arg3[%c0_3, %c0_4] : memref<1x32xf32, #tpu.memory_space<vmem>>, vector<1x32xf32>
    %4 = vector.broadcast %3 : vector<1x32xf32> to vector<512x32xf32>
    %5 = arith.addf %2, %4 : vector<512x32xf32>
    %cst_5 = arith.constant 0.000000e+00 : f32
    %6 = vector.broadcast %cst_5 : f32 to vector<512x32xf32>
    %7 = arith.maximumf %5, %6 : vector<512x32xf32>
    %c0_6 = arith.constant 0 : index
    %c0_7 = arith.constant 0 : index
    %8 = vector.load %arg4[%c0_6, %c0_7] : memref<32x32xf32, #tpu.memory_space<vmem>>, vector<32x32xf32>
    %cst_8 = arith.constant dense<0.000000e+00> : vector<512x32xf32>
    %9 = tpu.matmul %7, %8, %cst_8 {dimension_numbers = #tpu.dot_dimension_numbers<[1], [0], [0], [1], [0, 0, 1, 1], [], []>} : vector<512x32xf32>, vector<32x32xf32>, vector<512x32xf32> -> vector<512x32xf32>
    %c0_9 = arith.constant 0 : index
    %c0_10 = arith.constant 0 : index
    %10 = vector.load %arg5[%c0_9, %c0_10] : memref<1x32xf32, #tpu.memory_space<vmem>>, vector<1x32xf32>
    %11 = vector.broadcast %10 : vector<1x32xf32> to vector<512x32xf32>
    %12 = arith.addf %9, %11 : vector<512x32xf32>
    %c0_11 = arith.constant 0 : index
    %c0_12 = arith.constant 0 : index
    %13 = vector.load %arg6[%c0_11, %c0_12] : memref<512x32xf32, #tpu.memory_space<vmem>>, vector<512x32xf32>
    tpu.vector_store %arg6[%c0_11, %c0_12], %12 {strides = array<i32>} : memref<512x32xf32, #tpu.memory_space<vmem>>, vector<512x32xf32>,
    return
  }
  func.func @transform_0(%arg0: i32) -> (i32, i32) {
    %c0_i32 = arith.constant 0 : i32
    %c0_i32_0 = arith.constant 0 : i32
    return %arg0, %c0_i32 : i32, i32
  }
  func.func @transform_1(%arg0: i32) -> (i32, i32) {
    %c0_i32 = arith.constant 0 : i32
    %c0_i32_0 = arith.constant 0 : i32
    %c0_i32_1 = arith.constant 0 : i32
    return %c0_i32, %c0_i32_0 : i32, i32
  }
  func.func @transform_2(%arg0: i32) -> (i32, i32) {
    %c0_i32 = arith.constant 0 : i32
    %c0_i32_0 = arith.constant 0 : i32
    %c0_i32_1 = arith.constant 0 : i32
    return %c0_i32, %c0_i32_0 : i32, i32
  }
  func.func @transform_3(%arg0: i32) -> (i32, i32) {
    %c0_i32 = arith.constant 0 : i32
    %c0_i32_0 = arith.constant 0 : i32
    %c0_i32_1 = arith.constant 0 : i32
    return %c0_i32, %c0_i32_0 : i32, i32
  }
  func.func @transform_4(%arg0: i32) -> (i32, i32) {
    %c0_i32 = arith.constant 0 : i32
    %c0_i32_0 = arith.constant 0 : i32
    %c0_i32_1 = arith.constant 0 : i32
    return %c0_i32, %c0_i32_0 : i32, i32
  }
  func.func @transform_5(%arg0: i32) -> (i32, i32) {
    %c0_i32 = arith.constant 0 : i32
    %c0_i32_0 = arith.constant 0 : i32
    return %arg0, %c0_i32 : i32, i32
  }
}

</mosaic_0001>

<bundles_post_ra>
// kernel: tpu_custom_call.1
= control target key start
LH: loop header
LB: loop body
LE: loop exit
PB: predicated region body
PF: predicated region fallthrough
CT: control target
= control target key end

     0   :  { %vm96_vm0 = vcmask 293888   ;;  %vm289_vm1 = vcmask 1043456   ;;  %vm753_vm2 = vcmask 261120   ;;  %s2664_s1 = inlined_call_operand.vmem [shape: f32[36,32], index: 1, kind: input, shape index: {}]   ;;  %s2665_s0 = inlined_call_operand.vmem [shape: f32[512,36], index: 0, kind: input, shape index: {}]   ;;  %s2666_s3 = inlined_call_operand.vmem [shape: f32[32,32], index: 3, kind: input, shape index: {}]   ;;  %s2667_s2 = inlined_call_operand.vmem [shape: f32[1,32], index: 2, kind: input, shape index: {}]   ;;  %s2668_s4 = inlined_call_operand.vmem [shape: f32[1,32], index: 4, kind: input, shape index: {}]   ;;  %s2669_s5 = inlined_call_operand.vmem [shape: f32[512,32], index: 5, kind: output, shape index: {}]  }
   0x1   :  { %v84_v0 = vld [vmem:[%s2664_s1] sm:$0xff]  ;;  %v85_v1 = vld [vmem:[%s2664_s1 + $0x8] sm:$0xff]  ;;  %v86_v2 = vld [vmem:[%s2664_s1 + $0x10] sm:$0xff] }
   0x2   :  { %v1877_v3 = vpack.c.bf16 %v85_v1, %v84_v0  ;;  %v87_v4 = vld [vmem:[%s2664_s1 + $0x18] sm:$0xff]  ;;  %v20_v5 = vld [vmem:[%s2665_s0] sm:$0xff]  ;;  %v21_v8 = vld [vmem:[%s2665_s0 + $0x8] sm:$0xff] }
   0x3   :  { %v1881_v6 = vpack.c.bf16 %v87_v4, %v86_v2  ;;  %1677 = vmatprep.mubr.msk.f32.mxu0 %vm96_vm0, %v20_v5  ;;  %v88_v7 = vld [vmem:[%s2664_s1 + $0x20] sm:$0xf]  ;;  %v22_v9 = vld [vmem:[%s2665_s0 + $0x10] sm:$0xff]  ;;  %v23_v10 = vld [vmem:[%s2665_s0 + $0x18] sm:$0xff] }
   0x4   :  { %1878 = vmatprep.subr.bf16.mxu0 %v1877_v3  ;;  %v24_v11 = vld [vmem:[%s2665_s0 + $0x20] sm:$0xff]  ;;  %v25_v12 = vld [vmem:[%s2665_s0 + $0x28] sm:$0xff]  ;;  %v26_v13 = vld [vmem:[%s2665_s0 + $0x30] sm:$0xff] }
   0x5   :  { %1880 = vmatpush3.bf16.msra.mxu0 %v1877_v3  ;;  %v27_v14 = vld [vmem:[%s2665_s0 + $0x38] sm:$0xff]  ;;  %v28_v15 = vld [vmem:[%s2665_s0 + $0x40] sm:$0xff]  ;;  %v743_v17 = vld [vmem:[%s2666_s3 + $0x8] sm:$0xff] }
   0x6   :  { %1882 = vmatprep.subr.bf16.mxu0 %v1881_v6  ;;  %v742_v16 = vld [vmem:[%s2666_s3] sm:$0xff]  ;;  %v29_v19 = vld [vmem:[%s2665_s0 + $0x48] sm:$0xff]  ;;  %v30_v20 = vld [vmem:[%s2665_s0 + $0x50] sm:$0xff] }
   0x7   :  { %v1885_v18 = vpack.c.bf16 %v743_v17, %v742_v16  ;;  %v31_v21 = vld [vmem:[%s2665_s0 + $0x58] sm:$0xff]  ;;  %v32_v22 = vld [vmem:[%s2665_s0 + $0x60] sm:$0xff]  ;;  %v33_v23 = vld [vmem:[%s2665_s0 + $0x68] sm:$0xff] }
   0x8   :  { %v34_v24 = vld [vmem:[%s2665_s0 + $0x70] sm:$0xff]  ;;  %v35_v25 = vld [vmem:[%s2665_s0 + $0x78] sm:$0xff]  ;;  %v36_v26 = vld [vmem:[%s2665_s0 + $0x80] sm:$0xff] }
   0x9   :  { %1884 = vmatpush3.bf16.msra.mxu0 %v1881_v6  ;;  %1886 = vmatprep.subr.bf16.mxu1 %v1885_v18  ;;  %v37_v27 = vld [vmem:[%s2665_s0 + $0x88] sm:$0xff]  ;;  %v38_v28 = vld [vmem:[%s2665_s0 + $0x90] sm:$0xff]  ;;  %v39_v29 = vld [vmem:[%s2665_s0 + $0x98] sm:$0xff] }
   0xa   :  { %1675 = vmatprep.subr.msk.mxu0 %vm289_vm1, %v88_v7  ;;  %1888 = vmatpush3.bf16.msra.mxu1 %v1885_v18  ;;  %v40_v30 = vld [vmem:[%s2665_s0 + $0xa0] sm:$0xff]  ;;  %v41_v31 = vld [vmem:[%s2665_s0 + $0xa8] sm:$0xff]  ;;  %v42_v32 = vld [vmem:[%s2665_s0 + $0xb0] sm:$0xff] }
   0xb   :  { %v43_v33 = vld [vmem:[%s2665_s0 + $0xb8] sm:$0xff]  ;;  %v44_v34 = vld [vmem:[%s2665_s0 + $0xc0] sm:$0xff]  ;;  %v45_v35 = vld [vmem:[%s2665_s0 + $0xc8] sm:$0xff] }
   0xc   :  { %v46_v36 = vld [vmem:[%s2665_s0 + $0xd0] sm:$0xff]  ;;  %v47_v37 = vld [vmem:[%s2665_s0 + $0xd8] sm:$0xff]  ;;  %v48_v38 = vld [vmem:[%s2665_s0 + $0xe0] sm:$0xff] }
   0xd   :  { %1676 = vmatpush3.msk.msra.mxu0 %vm289_vm1, %v88_v7  ;;  %v49_v39 = vld [vmem:[%s2665_s0 + $0xe8] sm:$0xff]  ;;  %v50_v40 = vld [vmem:[%s2665_s0 + $0xf0] sm:$0xff]  ;;  %v51_v41 = vld [vmem:[%s2665_s0 + $0xf8] sm:$0xff] }
   0xe   :  { %1678 = vmatmul.mubr.msk.f32.vlgmr.msra.gmra.mrb[0].mxu0 %vm96_vm0, %v21_v8  ;;  %v52_v42 = vld [vmem:[%s2665_s0 + $0x100] sm:$0xff]  ;;  %v53_v43 = vld [vmem:[%s2665_s0 + $0x108] sm:$0xff]  ;;  %v54_v44 = vld [vmem:[%s2665_s0 + $0x110] sm:$0xff] }
   0xf   :  { %1680 = vmatprep.mubr.msk.f32.mxu0 %vm96_vm0, %v22_v9  ;;  %v55_v45 = vld [vmem:[%s2665_s0 + $0x118] sm:$0xff]  ;;  %v56_v46 = vld [vmem:[%s2665_s0 + $0x120] sm:$0xff]  ;;  %v57_v47 = vld [vmem:[%s2665_s0 + $0x128] sm:$0xff] }
  0x10   :  { %v58_v48 = vld [vmem:[%s2665_s0 + $0x130] sm:$0xff]  ;;  %v59_v49 = vld [vmem:[%s2665_s0 + $0x138] sm:$0xff]  ;;  %v60_v50 = vld [vmem:[%s2665_s0 + $0x140] sm:$0xff] }
  0x11   :  { %v61_v51 = vld [vmem:[%s2665_s0 + $0x148] sm:$0xff]  ;;  %v62_v52 = vld [vmem:[%s2665_s0 + $0x150] sm:$0xff]  ;;  %v63_v53 = vld [vmem:[%s2665_s0 + $0x158] sm:$0xff] }
  0x12   :  { %1681 = vmatmul.mubr.msk.f32.gmra.mrb[2].mxu0 %vm96_vm0, %v23_v10  ;;  %v64_v54 = vld [vmem:[%s2665_s0 + $0x160] sm:$0xff]  ;;  %v744_v55 = vld [vmem:[%s2666_s3 + $0x10] sm:$0xff]  ;;  %v745_v56 = vld [vmem:[%s2666_s3 + $0x18] sm:$0xff] }
  0x13   :  { %1683 = vmatprep.mubr.msk.f32.mxu0 %vm96_vm0, %v24_v11  ;;  %v1889_v57 = vpack.c.bf16 %v745_v56, %v744_v55  ;;  %v65_v58 = vld [vmem:[%s2665_s0 + $0x168] sm:$0xff]  ;;  %v66_v59 = vld [vmem:[%s2665_s0 + $0x170] sm:$0xff]  ;;  %v67_v60 = vld [vmem:[%s2665_s0 + $0x178] sm:$0xff] }
  0x14   :  { %v68_v61 = vld [vmem:[%s2665_s0 + $0x180] sm:$0xff]  ;;  %v69_v62 = vld [vmem:[%s2665_s0 + $0x188] sm:$0xff]  ;;  %v70_v63 = vld [vmem:[%s2665_s0 + $0x190] sm:$0xff] }
  0x15   :  { %1890 = vmatprep.subr.bf16.mxu1 %v1889_v57  ;;  %v71_v0 = vld [vmem:[%s2665_s0 + $0x198] sm:$0xff]  ;;  %v72_v1 = vld [vmem:[%s2665_s0 + $0x1a0] sm:$0xff]  ;;  %v73_v2 = vld [vmem:[%s2665_s0 + $0x1a8] sm:$0xff] }
  0x16   :  { %1684 = vmatmul.mubr.msk.f32.gmra.mrb[4].mxu0 %vm96_vm0, %v25_v12  ;;  %1892 = vmatpush3.bf16.msra.mxu1 %v1889_v57  ;;  %v74_v3 = vld [vmem:[%s2665_s0 + $0x1b0] sm:$0xff]  ;;  %v75_v4 = vld [vmem:[%s2665_s0 + $0x1b8] sm:$0xff]  ;;  %v76_v5 = vld [vmem:[%s2665_s0 + $0x1c0] sm:$0xff] }
  0x17   :  { %1686 = vmatprep.mubr.msk.f32.mxu0 %vm96_vm0, %v26_v13  ;;  %v77_v6 = vld [vmem:[%s2665_s0 + $0x1c8] sm:$0xff]  ;;  %v78_v7 = vld [vmem:[%s2665_s0 + $0x1d0] sm:$0xff]  ;;  %v79_v8 = vld [vmem:[%s2665_s0 + $0x1d8] sm:$0xff] }
  0x18   :  { %v80_v9 = vld [vmem:[%s2665_s0 + $0x1e0] sm:$0xff]  ;;  %v81_v10 = vld [vmem:[%s2665_s0 + $0x1e8] sm:$0xff]  ;;  %v82_v11 = vld [vmem:[%s2665_s0 + $0x1f0] sm:$0xff] }
  0x19   :  { %v83_v12 = vld [vmem:[%s2665_s0 + $0x1f8] sm:$0xff]  ;;  %v2209_v13 = vld [vmem:[%s2667_s2] ss:$0 sm:$0xff] }
  0x1a   :  { %1687 = vmatmul.mubr.msk.f32.gmra.mrb[6].mxu0 %vm96_vm0, %v27_v14 }
  0x1b   :  { %1689 = vmatprep.mubr.msk.f32.mxu0 %vm96_vm0, %v28_v15 }
  0x1e   :  { %1690 = vmatmul.mubr.msk.f32.gmra.mrb[8].mxu0 %vm96_vm0, %v29_v19 }
  0x1f   :  { %1692 = vmatprep.mubr.msk.f32.mxu0 %vm96_vm0, %v30_v20 }
  0x22   :  { %1693 = vmatmul.mubr.msk.f32.gmra.mrb[10].mxu0 %vm96_vm0, %v31_v21 }
  0x23   :  { %1695 = vmatprep.mubr.msk.f32.mxu0 %vm96_vm0, %v32_v22 }
  0x26   :  { %1696 = vmatmul.mubr.msk.f32.gmra.mrb[12].mxu0 %vm96_vm0, %v33_v23 }
  0x27   :  { %1698 = vmatprep.mubr.msk.f32.mxu0 %vm96_vm0, %v34_v24 }
  0x2a   :  { %1699 = vmatmul.mubr.msk.f32.gmra.mrb[14].mxu0 %vm96_vm0, %v35_v25 }
  0x2b   :  { %1701 = vmatprep.mubr.msk.f32.mxu0 %vm96_vm0, %v36_v26 }
  0x2e   :  { %1702 = vmatmul.mubr.msk.f32.gmra.mrb[16].mxu0 %vm96_vm0, %v37_v27 }
  0x2f   :  { %1704 = vmatprep.mubr.msk.f32.mxu0 %vm96_vm0, %v38_v28 }
  0x32   :  { %1705 = vmatmul.mubr.msk.f32.gmra.mrb[18].mxu0 %vm96_vm0, %v39_v29 }
  0x33   :  { %1707 = vmatprep.mubr.msk.f32.mxu0 %vm96_vm0, %v40_v30 }
  0x36   :  { %1708 = vmatmul.mubr.msk.f32.gmra.mrb[20].mxu0 %vm96_vm0, %v41_v31 }
  0x37   :  { %1710 = vmatprep.mubr.msk.f32.mxu0 %vm96_vm0, %v42_v32 }
  0x3a   :  { %1711 = vmatmul.mubr.msk.f32.gmra.mrb[22].mxu0 %vm96_vm0, %v43_v33 }
  0x3b   :  { %1713 = vmatprep.mubr.msk.f32.mxu0 %vm96_vm0, %v44_v34 }
  0x3e   :  { %1714 = vmatmul.mubr.msk.f32.gmra.mrb[24].mxu0 %vm96_vm0, %v45_v35 }
  0x3f   :  { %1716 = vmatprep.mubr.msk.f32.mxu0 %vm96_vm0, %v46_v36 }
  0x42   :  { %1717 = vmatmul.mubr.msk.f32.gmra.mrb[26].mxu0 %vm96_vm0, %v47_v37 }
  0x43   :  { %1719 = vmatprep.mubr.msk.f32.mxu0 %vm96_vm0, %v48_v38 }
  0x46   :  { %1720 = vmatmul.mubr.msk.f32.gmra.mrb[28].mxu0 %vm96_vm0, %v49_v39 }
  0x47   :  { %1722 = vmatprep.mubr.msk.f32.mxu0 %vm96_vm0, %v50_v40 }
  0x4a   :  { %1723 = vmatmul.mubr.msk.f32.gmra.mrb[30].mxu0 %vm96_vm0, %v51_v41 }
  0x4b   :  { %1725 = vmatprep.mubr.msk.f32.mxu0 %vm96_vm0, %v52_v42 }
  0x4e   :  { %1726 = vmatmul.mubr.msk.f32.gmra.mrb[32].mxu0 %vm96_vm0, %v53_v43 }
  0x4f   :  { %1728 = vmatprep.mubr.msk.f32.mxu0 %vm96_vm0, %v54_v44 }
  0x52   :  { %1729 = vmatmul.mubr.msk.f32.gmra.mrb[34].mxu0 %vm96_vm0, %v55_v45 }
  0x53   :  { %1731 = vmatprep.mubr.msk.f32.mxu0 %vm96_vm0, %v56_v46 }
  0x56   :  { %1732 = vmatmul.mubr.msk.f32.gmra.mrb[36].mxu0 %vm96_vm0, %v57_v47 }
  0x57   :  { %1734 = vmatprep.mubr.msk.f32.mxu0 %vm96_vm0, %v58_v48 }
  0x5a   :  { %1735 = vmatmul.mubr.msk.f32.gmra.mrb[38].mxu0 %vm96_vm0, %v59_v49 }
  0x5b   :  { %1737 = vmatprep.mubr.msk.f32.mxu0 %vm96_vm0, %v60_v50 }
  0x5e   :  { %1738 = vmatmul.mubr.msk.f32.gmra.mrb[40].mxu0 %vm96_vm0, %v61_v51 }
  0x5f   :  { %1740 = vmatprep.mubr.msk.f32.mxu0 %vm96_vm0, %v62_v52 }
  0x62   :  { %1741 = vmatmul.mubr.msk.f32.gmra.mrb[42].mxu0 %vm96_vm0, %v63_v53 }
  0x63   :  { %1743 = vmatprep.mubr.msk.f32.mxu0 %vm96_vm0, %v64_v54 }
  0x66   :  { %1744 = vmatmul.mubr.msk.f32.gmra.mrb[44].mxu0 %vm96_vm0, %v65_v58 }
  0x67   :  { %1746 = vmatprep.mubr.msk.f32.mxu0 %vm96_vm0, %v66_v59 }
  0x6a   :  { %1747 = vmatmul.mubr.msk.f32.gmra.mrb[46].mxu0 %vm96_vm0, %v67_v60 }
  0x6b   :  { %1749 = vmatprep.mubr.msk.f32.mxu0 %vm96_vm0, %v68_v61 }
  0x6e   :  { %1750 = vmatmul.mubr.msk.f32.gmra.mrb[48].mxu0 %vm96_vm0, %v69_v62 }
  0x6f   :  { %1752 = vmatprep.mubr.msk.f32.mxu0 %vm96_vm0, %v70_v63 }
  0x72   :  { %1753 = vmatmul.mubr.msk.f32.gmra.mrb[50].mxu0 %vm96_vm0, %v71_v0 }
  0x73   :  { %1755 = vmatprep.mubr.msk.f32.mxu0 %vm96_vm0, %v72_v1 }
  0x76   :  { %1756 = vmatmul.mubr.msk.f32.gmra.mrb[52].mxu0 %vm96_vm0, %v73_v2 }
  0x77   :  { %1758 = vmatprep.mubr.msk.f32.mxu0 %vm96_vm0, %v74_v3 }
  0x7a   :  { %1759 = vmatmul.mubr.msk.f32.gmra.mrb[54].mxu0 %vm96_vm0, %v75_v4 }
  0x7b   :  { %1761 = vmatprep.mubr.msk.f32.mxu0 %vm96_vm0, %v76_v5 }
  0x7e   :  { %1762 = vmatmul.mubr.msk.f32.gmra.mrb[56].mxu0 %vm96_vm0, %v77_v6 }
  0x7f   :  { %1764 = vmatprep.mubr.msk.f32.mxu0 %vm96_vm0, %v78_v7 }
  0x82   :  { %1765 = vmatmul.mubr.msk.f32.gmra.mrb[58].mxu0 %vm96_vm0, %v79_v8 }
  0x83   :  { %1767 = vmatprep.mubr.msk.f32.mxu0 %vm96_vm0, %v80_v9 }
  0x86   :  { %1768 = vmatmul.mubr.msk.f32.gmra.mrb[60].mxu0 %vm96_vm0, %v81_v10 }
  0x87   :  { %1770 = vmatprep.mubr.msk.f32.mxu0 %vm96_vm0, %v82_v11 }
  0x8a   :  { %1771 = vmatmul.mubr.msk.f32.gmra.mrb[62].mxu0 %vm96_vm0, %v83_v12 }
  0xe1   :  { %v1679_v14 = vpop.f32.mrb[0].mxu0 }
  0xe2   :  { %v365_v15 = vadd.f32 %v1679_v14, %v2209_v13  ;;  %v359_v16 = vpop.f32.mrb[1].mxu0 }
  0xe3   :  { %v360_v17 = vadd.f32 %v2209_v13, %v359_v16 }
  0xe4   :  { %v679_v20 = vmax.f32 %v365_v15, 0.0 }
  0xe5   :  { %v678_v18 = vmax.f32 %v360_v17, 0.0  ;;  %v1682_v19 = vpop.f32.mrb[2].mxu0 }
  0xe6   :  { %v375_v21 = vadd.f32 %v1682_v19, %v2209_v13  ;;  %v369_v22 = vpop.f32.mrb[3].mxu0 }
  0xe7   :  { %v370_v23 = vadd.f32 %v2209_v13, %v369_v22  ;;  %1781 = vmatprep.mubr.msk.f32.mxu1 %vm753_vm2, %v678_v18 }
  0xe8   :  { %1782 = vmatmul.mubr.msk.f32.vlgmr.msra.gmra.mrb[0].mxu1 %vm753_vm2, %v679_v20  ;;  %v681_v26 = vmax.f32 %v375_v21, 0.0 }
  0xe9   :  { %v680_v24 = vmax.f32 %v370_v23, 0.0  ;;  %v1685_v25 = vpop.f32.mrb[4].mxu0 }
  0xea   :  { %v385_v27 = vadd.f32 %v1685_v25, %v2209_v13  ;;  %v379_v28 = vpop.f32.mrb[5].mxu0 }
  0xeb   :  { %v380_v29 = vadd.f32 %v2209_v13, %v379_v28  ;;  %1784 = vmatprep.mubr.msk.f32.mxu1 %vm753_vm2, %v680_v24 }
  0xec   :  { %1785 = vmatmul.mubr.msk.f32.gmra.mrb[2].mxu1 %vm753_vm2, %v681_v26  ;;  %v683_v32 = vmax.f32 %v385_v27, 0.0 }
  0xed   :  { %v682_v30 = vmax.f32 %v380_v29, 0.0  ;;  %v1688_v31 = vpop.f32.mrb[6].mxu0 }
  0xee   :  { %v395_v33 = vadd.f32 %v1688_v31, %v2209_v13  ;;  %v389_v34 = vpop.f32.mrb[7].mxu0 }
  0xef   :  { %v390_v35 = vadd.f32 %v2209_v13, %v389_v34  ;;  %1787 = vmatprep.mubr.msk.f32.mxu1 %vm753_vm2, %v682_v30 }
  0xf0   :  { %1788 = vmatmul.mubr.msk.f32.gmra.mrb[4].mxu1 %vm753_vm2, %v683_v32  ;;  %v685_v38 = vmax.f32 %v395_v33, 0.0 }
  0xf1   :  { %v684_v36 = vmax.f32 %v390_v35, 0.0  ;;  %v1691_v37 = vpop.f32.mrb[8].mxu0 }
  0xf2   :  { %v405_v39 = vadd.f32 %v1691_v37, %v2209_v13  ;;  %v399_v40 = vpop.f32.mrb[9].mxu0 }
  0xf3   :  { %v400_v41 = vadd.f32 %v2209_v13, %v399_v40  ;;  %1790 = vmatprep.mubr.msk.f32.mxu1 %vm753_vm2, %v684_v36 }
  0xf4   :  { %1791 = vmatmul.mubr.msk.f32.gmra.mrb[6].mxu1 %vm753_vm2, %v685_v38  ;;  %v687_v44 = vmax.f32 %v405_v39, 0.0 }
  0xf5   :  { %v686_v42 = vmax.f32 %v400_v41, 0.0  ;;  %v1694_v43 = vpop.f32.mrb[10].mxu0 }
  0xf6   :  { %v415_v45 = vadd.f32 %v1694_v43, %v2209_v13  ;;  %v409_v46 = vpop.f32.mrb[11].mxu0 }
  0xf7   :  { %v410_v47 = vadd.f32 %v2209_v13, %v409_v46  ;;  %1793 = vmatprep.mubr.msk.f32.mxu1 %vm753_vm2, %v686_v42 }
  0xf8   :  { %1794 = vmatmul.mubr.msk.f32.gmra.mrb[8].mxu1 %vm753_vm2, %v687_v44  ;;  %v689_v50 = vmax.f32 %v415_v45, 0.0 }
  0xf9   :  { %v688_v48 = vmax.f32 %v410_v47, 0.0  ;;  %v1697_v49 = vpop.f32.mrb[12].mxu0 }
  0xfa   :  { %v425_v51 = vadd.f32 %v1697_v49, %v2209_v13  ;;  %v419_v52 = vpop.f32.mrb[13].mxu0 }
  0xfb   :  { %v420_v53 = vadd.f32 %v2209_v13, %v419_v52  ;;  %1796 = vmatprep.mubr.msk.f32.mxu1 %vm753_vm2, %v688_v48 }
  0xfc   :  { %1797 = vmatmul.mubr.msk.f32.gmra.mrb[10].mxu1 %vm753_vm2, %v689_v50  ;;  %v691_v56 = vmax.f32 %v425_v51, 0.0 }
  0xfd   :  { %v690_v54 = vmax.f32 %v420_v53, 0.0  ;;  %v1700_v55 = vpop.f32.mrb[14].mxu0 }
  0xfe   :  { %v435_v57 = vadd.f32 %v1700_v55, %v2209_v13  ;;  %v429_v58 = vpop.f32.mrb[15].mxu0 }
  0xff   :  { %v430_v59 = vadd.f32 %v2209_v13, %v429_v58  ;;  %1799 = vmatprep.mubr.msk.f32.mxu1 %vm753_vm2, %v690_v54 }
 0x100   :  { %1800 = vmatmul.mubr.msk.f32.gmra.mrb[12].mxu1 %vm753_vm2, %v691_v56  ;;  %v693_v62 = vmax.f32 %v435_v57, 0.0 }
 0x101   :  { %v692_v60 = vmax.f32 %v430_v59, 0.0  ;;  %v1703_v61 = vpop.f32.mrb[16].mxu0 }
 0x102   :  { %v445_v63 = vadd.f32 %v1703_v61, %v2209_v13  ;;  %v439_v0 = vpop.f32.mrb[17].mxu0 }
 0x103   :  { %v440_v1 = vadd.f32 %v2209_v13, %v439_v0  ;;  %1802 = vmatprep.mubr.msk.f32.mxu1 %vm753_vm2, %v692_v60 }
 0x104   :  { %1803 = vmatmul.mubr.msk.f32.gmra.mrb[14].mxu1 %vm753_vm2, %v693_v62  ;;  %v695_v4 = vmax.f32 %v445_v63, 0.0 }
 0x105   :  { %v694_v2 = vmax.f32 %v440_v1, 0.0  ;;  %v1706_v3 = vpop.f32.mrb[18].mxu0 }
 0x106   :  { %v455_v5 = vadd.f32 %v1706_v3, %v2209_v13  ;;  %v449_v6 = vpop.f32.mrb[19].mxu0 }
 0x107   :  { %v450_v7 = vadd.f32 %v2209_v13, %v449_v6  ;;  %1805 = vmatprep.mubr.msk.f32.mxu1 %vm753_vm2, %v694_v2 }
 0x108   :  { %1806 = vmatmul.mubr.msk.f32.gmra.mrb[16].mxu1 %vm753_vm2, %v695_v4  ;;  %v697_v10 = vmax.f32 %v455_v5, 0.0 }
 0x109   :  { %v696_v8 = vmax.f32 %v450_v7, 0.0  ;;  %v1709_v9 = vpop.f32.mrb[20].mxu0 }
 0x10a   :  { %v465_v11 = vadd.f32 %v1709_v9, %v2209_v13  ;;  %v459_v12 = vpop.f32.mrb[21].mxu0 }
 0x10b   :  { %v460_v14 = vadd.f32 %v2209_v13, %v459_v12  ;;  %1808 = vmatprep.mubr.msk.f32.mxu1 %vm753_vm2, %v696_v8 }
 0x10c   :  { %1809 = vmatmul.mubr.msk.f32.gmra.mrb[18].mxu1 %vm753_vm2, %v697_v10  ;;  %v699_v17 = vmax.f32 %v465_v11, 0.0 }
 0x10d   :  { %v698_v15 = vmax.f32 %v460_v14, 0.0  ;;  %v1712_v16 = vpop.f32.mrb[22].mxu0 }
 0x10e   :  { %v475_v18 = vadd.f32 %v1712_v16, %v2209_v13  ;;  %v469_v19 = vpop.f32.mrb[23].mxu0 }
 0x10f   :  { %v470_v20 = vadd.f32 %v2209_v13, %v469_v19  ;;  %1811 = vmatprep.mubr.msk.f32.mxu1 %vm753_vm2, %v698_v15 }
 0x110   :  { %1812 = vmatmul.mubr.msk.f32.gmra.mrb[20].mxu1 %vm753_vm2, %v699_v17  ;;  %v701_v23 = vmax.f32 %v475_v18, 0.0 }
 0x111   :  { %v700_v21 = vmax.f32 %v470_v20, 0.0  ;;  %v1715_v22 = vpop.f32.mrb[24].mxu0 }
 0x112   :  { %v485_v24 = vadd.f32 %v1715_v22, %v2209_v13  ;;  %v479_v25 = vpop.f32.mrb[25].mxu0 }
 0x113   :  { %v480_v26 = vadd.f32 %v2209_v13, %v479_v25  ;;  %1814 = vmatprep.mubr.msk.f32.mxu1 %vm753_vm2, %v700_v21 }
 0x114   :  { %1815 = vmatmul.mubr.msk.f32.gmra.mrb[22].mxu1 %vm753_vm2, %v701_v23  ;;  %v703_v29 = vmax.f32 %v485_v24, 0.0 }
 0x115   :  { %v702_v27 = vmax.f32 %v480_v26, 0.0  ;;  %v1718_v28 = vpop.f32.mrb[26].mxu0 }
 0x116   :  { %v495_v30 = vadd.f32 %v1718_v28, %v2209_v13  ;;  %v489_v31 = vpop.f32.mrb[27].mxu0 }
 0x117   :  { %v490_v32 = vadd.f32 %v2209_v13, %v489_v31  ;;  %1817 = vmatprep.mubr.msk.f32.mxu1 %vm753_vm2, %v702_v27 }
 0x118   :  { %1818 = vmatmul.mubr.msk.f32.gmra.mrb[24].mxu1 %vm753_vm2, %v703_v29  ;;  %v705_v35 = vmax.f32 %v495_v30, 0.0 }
 0x119   :  { %v704_v33 = vmax.f32 %v490_v32, 0.0  ;;  %v1721_v34 = vpop.f32.mrb[28].mxu0 }
 0x11a   :  { %v505_v36 = vadd.f32 %v1721_v34, %v2209_v13  ;;  %v499_v37 = vpop.f32.mrb[29].mxu0 }
 0x11b   :  { %v500_v38 = vadd.f32 %v2209_v13, %v499_v37  ;;  %1820 = vmatprep.mubr.msk.f32.mxu1 %vm753_vm2, %v704_v33 }
 0x11c   :  { %1821 = vmatmul.mubr.msk.f32.gmra.mrb[26].mxu1 %vm753_vm2, %v705_v35  ;;  %v707_v41 = vmax.f32 %v505_v36, 0.0 }
 0x11d   :  { %v706_v39 = vmax.f32 %v500_v38, 0.0  ;;  %v1724_v40 = vpop.f32.mrb[30].mxu0 }
 0x11e   :  { %v515_v42 = vadd.f32 %v1724_v40, %v2209_v13  ;;  %v509_v43 = vpop.f32.mrb[31].mxu0 }
 0x11f   :  { %v510_v44 = vadd.f32 %v2209_v13, %v509_v43  ;;  %1823 = vmatprep.mubr.msk.f32.mxu1 %vm753_vm2, %v706_v39 }
 0x120   :  { %1824 = vmatmul.mubr.msk.f32.gmra.mrb[28].mxu1 %vm753_vm2, %v707_v41  ;;  %v709_v47 = vmax.f32 %v515_v42, 0.0 }
 0x121   :  { %v708_v45 = vmax.f32 %v510_v44, 0.0  ;;  %v1727_v46 = vpop.f32.mrb[32].mxu0 }
 0x122   :  { %v525_v48 = vadd.f32 %v1727_v46, %v2209_v13  ;;  %v519_v49 = vpop.f32.mrb[33].mxu0 }
 0x123   :  { %v520_v50 = vadd.f32 %v2209_v13, %v519_v49  ;;  %1826 = vmatprep.mubr.msk.f32.mxu1 %vm753_vm2, %v708_v45 }
 0x124   :  { %1827 = vmatmul.mubr.msk.f32.gmra.mrb[30].mxu1 %vm753_vm2, %v709_v47  ;;  %v711_v53 = vmax.f32 %v525_v48, 0.0 }
 0x125   :  { %v710_v51 = vmax.f32 %v520_v50, 0.0  ;;  %v1730_v52 = vpop.f32.mrb[34].mxu0 }
 0x126   :  { %v535_v54 = vadd.f32 %v1730_v52, %v2209_v13  ;;  %v529_v55 = vpop.f32.mrb[35].mxu0 }
 0x127   :  { %v530_v56 = vadd.f32 %v2209_v13, %v529_v55  ;;  %1829 = vmatprep.mubr.msk.f32.mxu1 %vm753_vm2, %v710_v51 }
 0x128   :  { %1830 = vmatmul.mubr.msk.f32.gmra.mrb[32].mxu1 %vm753_vm2, %v711_v53  ;;  %v713_v59 = vmax.f32 %v535_v54, 0.0 }
 0x129   :  { %v712_v57 = vmax.f32 %v530_v56, 0.0  ;;  %v1733_v58 = vpop.f32.mrb[36].mxu0 }
 0x12a   :  { %v545_v60 = vadd.f32 %v1733_v58, %v2209_v13  ;;  %v539_v61 = vpop.f32.mrb[37].mxu0 }
 0x12b   :  { %v540_v62 = vadd.f32 %v2209_v13, %v539_v61  ;;  %1832 = vmatprep.mubr.msk.f32.mxu1 %vm753_vm2, %v712_v57 }
 0x12c   :  { %1833 = vmatmul.mubr.msk.f32.gmra.mrb[34].mxu1 %vm753_vm2, %v713_v59  ;;  %v715_v1 = vmax.f32 %v545_v60, 0.0 }
 0x12d   :  { %v714_v63 = vmax.f32 %v540_v62, 0.0  ;;  %v1736_v0 = vpop.f32.mrb[38].mxu0 }
 0x12e   :  { %v555_v2 = vadd.f32 %v1736_v0, %v2209_v13  ;;  %v549_v3 = vpop.f32.mrb[39].mxu0 }
 0x12f   :  { %v550_v4 = vadd.f32 %v2209_v13, %v549_v3  ;;  %1835 = vmatprep.mubr.msk.f32.mxu1 %vm753_vm2, %v714_v63 }
 0x130   :  { %1836 = vmatmul.mubr.msk.f32.gmra.mrb[36].mxu1 %vm753_vm2, %v715_v1  ;;  %v717_v7 = vmax.f32 %v555_v2, 0.0 }
 0x131   :  { %v716_v5 = vmax.f32 %v550_v4, 0.0  ;;  %v1739_v6 = vpop.f32.mrb[40].mxu0 }
 0x132   :  { %v565_v8 = vadd.f32 %v1739_v6, %v2209_v13  ;;  %v559_v9 = vpop.f32.mrb[41].mxu0 }
 0x133   :  { %v560_v10 = vadd.f32 %v2209_v13, %v559_v9  ;;  %1838 = vmatprep.mubr.msk.f32.mxu1 %vm753_vm2, %v716_v5 }
 0x134   :  { %1839 = vmatmul.mubr.msk.f32.gmra.mrb[38].mxu1 %vm753_vm2, %v717_v7  ;;  %v719_v14 = vmax.f32 %v565_v8, 0.0 }
 0x135   :  { %v718_v11 = vmax.f32 %v560_v10, 0.0  ;;  %v1742_v12 = vpop.f32.mrb[42].mxu0 }
 0x136   :  { %v575_v15 = vadd.f32 %v1742_v12, %v2209_v13  ;;  %v569_v16 = vpop.f32.mrb[43].mxu0 }
 0x137   :  { %v570_v17 = vadd.f32 %v2209_v13, %v569_v16  ;;  %1841 = vmatprep.mubr.msk.f32.mxu1 %vm753_vm2, %v718_v11 }
 0x138   :  { %1842 = vmatmul.mubr.msk.f32.gmra.mrb[40].mxu1 %vm753_vm2, %v719_v14  ;;  %v721_v20 = vmax.f32 %v575_v15, 0.0 }
 0x139   :  { %v720_v18 = vmax.f32 %v570_v17, 0.0  ;;  %v1745_v19 = vpop.f32.mrb[44].mxu0  ;;  %v2342_v17 = vld [vmem:[%s2668_s4] ss:$0 sm:$0xff] }
 0x13a   :  { %v585_v21 = vadd.f32 %v1745_v19, %v2209_v13  ;;  %v579_v22 = vpop.f32.mrb[45].mxu0 }
 0x13b   :  { %v580_v23 = vadd.f32 %v2209_v13, %v579_v22  ;;  %1844 = vmatprep.mubr.msk.f32.mxu1 %vm753_vm2, %v720_v18 }
 0x13c   :  { %1845 = vmatmul.mubr.msk.f32.gmra.mrb[42].mxu1 %vm753_vm2, %v721_v20  ;;  %v723_v26 = vmax.f32 %v585_v21, 0.0 }
 0x13d   :  { %v722_v24 = vmax.f32 %v580_v23, 0.0  ;;  %v1748_v25 = vpop.f32.mrb[46].mxu0 }
 0x13e   :  { %v595_v27 = vadd.f32 %v1748_v25, %v2209_v13  ;;  %v589_v28 = vpop.f32.mrb[47].mxu0 }
 0x13f   :  { %v590_v29 = vadd.f32 %v2209_v13, %v589_v28  ;;  %1847 = vmatprep.mubr.msk.f32.mxu1 %vm753_vm2, %v722_v24 }
 0x140   :  { %1848 = vmatmul.mubr.msk.f32.gmra.mrb[44].mxu1 %vm753_vm2, %v723_v26  ;;  %v725_v32 = vmax.f32 %v595_v27, 0.0 }
 0x141   :  { %v724_v30 = vmax.f32 %v590_v29, 0.0  ;;  %v1751_v31 = vpop.f32.mrb[48].mxu0 }
 0x142   :  { %v605_v33 = vadd.f32 %v1751_v31, %v2209_v13  ;;  %v599_v34 = vpop.f32.mrb[49].mxu0 }
 0x143   :  { %v600_v35 = vadd.f32 %v2209_v13, %v599_v34  ;;  %1850 = vmatprep.mubr.msk.f32.mxu1 %vm753_vm2, %v724_v30 }
 0x144   :  { %1851 = vmatmul.mubr.msk.f32.gmra.mrb[46].mxu1 %vm753_vm2, %v725_v32  ;;  %v727_v38 = vmax.f32 %v605_v33, 0.0 }
 0x145   :  { %v726_v36 = vmax.f32 %v600_v35, 0.0  ;;  %v1754_v37 = vpop.f32.mrb[50].mxu0 }
 0x146   :  { %v615_v39 = vadd.f32 %v1754_v37, %v2209_v13  ;;  %v609_v40 = vpop.f32.mrb[51].mxu0 }
 0x147   :  { %v610_v41 = vadd.f32 %v2209_v13, %v609_v40  ;;  %1853 = vmatprep.mubr.msk.f32.mxu1 %vm753_vm2, %v726_v36 }
 0x148   :  { %1854 = vmatmul.mubr.msk.f32.gmra.mrb[48].mxu1 %vm753_vm2, %v727_v38  ;;  %v729_v44 = vmax.f32 %v615_v39, 0.0 }
 0x149   :  { %v728_v42 = vmax.f32 %v610_v41, 0.0  ;;  %v1757_v43 = vpop.f32.mrb[52].mxu0 }
 0x14a   :  { %v625_v45 = vadd.f32 %v1757_v43, %v2209_v13  ;;  %v619_v46 = vpop.f32.mrb[53].mxu0 }
 0x14b   :  { %v620_v47 = vadd.f32 %v2209_v13, %v619_v46  ;;  %1856 = vmatprep.mubr.msk.f32.mxu1 %vm753_vm2, %v728_v42 }
 0x14c   :  { %1857 = vmatmul.mubr.msk.f32.gmra.mrb[50].mxu1 %vm753_vm2, %v729_v44  ;;  %v731_v50 = vmax.f32 %v625_v45, 0.0 }
 0x14d   :  { %v730_v48 = vmax.f32 %v620_v47, 0.0  ;;  %v1760_v49 = vpop.f32.mrb[54].mxu0 }
 0x14e   :  { %v635_v51 = vadd.f32 %v1760_v49, %v2209_v13  ;;  %v629_v52 = vpop.f32.mrb[55].mxu0 }
 0x14f   :  { %v630_v53 = vadd.f32 %v2209_v13, %v629_v52  ;;  %1859 = vmatprep.mubr.msk.f32.mxu1 %vm753_vm2, %v730_v48 }
 0x150   :  { %1860 = vmatmul.mubr.msk.f32.gmra.mrb[52].mxu1 %vm753_vm2, %v731_v50  ;;  %v733_v56 = vmax.f32 %v635_v51, 0.0 }
 0x151   :  { %v732_v54 = vmax.f32 %v630_v53, 0.0  ;;  %v1763_v55 = vpop.f32.mrb[56].mxu0 }
 0x152   :  { %v645_v57 = vadd.f32 %v1763_v55, %v2209_v13  ;;  %v639_v58 = vpop.f32.mrb[57].mxu0 }
 0x153   :  { %v640_v59 = vadd.f32 %v2209_v13, %v639_v58  ;;  %1862 = vmatprep.mubr.msk.f32.mxu1 %vm753_vm2, %v732_v54 }
 0x154   :  { %1863 = vmatmul.mubr.msk.f32.gmra.mrb[54].mxu1 %vm753_vm2, %v733_v56  ;;  %v735_v62 = vmax.f32 %v645_v57, 0.0 }
 0x155   :  { %v734_v60 = vmax.f32 %v640_v59, 0.0  ;;  %v1766_v61 = vpop.f32.mrb[58].mxu0 }
 0x156   :  { %v655_v63 = vadd.f32 %v1766_v61, %v2209_v13  ;;  %v649_v0 = vpop.f32.mrb[59].mxu0 }
 0x157   :  { %v650_v1 = vadd.f32 %v2209_v13, %v649_v0  ;;  %1865 = vmatprep.mubr.msk.f32.mxu1 %vm753_vm2, %v734_v60 }
 0x158   :  { %1866 = vmatmul.mubr.msk.f32.gmra.mrb[56].mxu1 %vm753_vm2, %v735_v62  ;;  %v737_v4 = vmax.f32 %v655_v63, 0.0 }
 0x159   :  { %v736_v2 = vmax.f32 %v650_v1, 0.0  ;;  %v1769_v3 = vpop.f32.mrb[60].mxu0 }
 0x15a   :  { %v665_v5 = vadd.f32 %v1769_v3, %v2209_v13  ;;  %v659_v6 = vpop.f32.mrb[61].mxu0 }
 0x15b   :  { %v660_v7 = vadd.f32 %v2209_v13, %v659_v6  ;;  %1868 = vmatprep.mubr.msk.f32.mxu1 %vm753_vm2, %v736_v2 }
 0x15c   :  { %1869 = vmatmul.mubr.msk.f32.gmra.mrb[58].mxu1 %vm753_vm2, %v737_v4  ;;  %v739_v10 = vmax.f32 %v665_v5, 0.0 }
 0x15d   :  { %v738_v8 = vmax.f32 %v660_v7, 0.0  ;;  %v1772_v9 = vpop.f32.mrb[62].mxu0 }
 0x15e   :  { %v675_v11 = vadd.f32 %v1772_v9, %v2209_v13  ;;  %v669_v12 = vpop.f32.mrb[63].mxu0 }
 0x15f   :  { %v670_v14 = vadd.f32 %v2209_v13, %v669_v12  ;;  %1871 = vmatprep.mubr.msk.f32.mxu1 %vm753_vm2, %v738_v8 }
 0x160   :  { %1872 = vmatmul.mubr.msk.f32.gmra.mrb[60].mxu1 %vm753_vm2, %v739_v10  ;;  %v741_v16 = vmax.f32 %v675_v11, 0.0 }
 0x161   :  { %v740_v15 = vmax.f32 %v670_v14, 0.0 }
 0x163   :  { %1874 = vmatprep.mubr.msk.f32.mxu1 %vm753_vm2, %v740_v15 }
 0x164   :  { %1875 = vmatmul.mubr.msk.f32.gmra.mrb[62].mxu1 %vm753_vm2, %v741_v16 }
 0x1bb   :  { %v1783_v18 = vpop.f32.mrb[0].mxu1 }
 0x1bc   :  { %v1018_v19 = vadd.f32 %v1783_v18, %v2342_v17  ;;  %v1012_v20 = vpop.f32.mrb[1].mxu1 }
 0x1bd   :  { %v1013_v13 = vadd.f32 %v2342_v17, %v1012_v20 }
 0x1be   :  { %1332 = vst.msk [vmem:[%s2669_s5 + $0x8] sm:$0xff] %vm753_vm2, %v1018_v19 }
 0x1bf   :  { %1331 = vst.msk [vmem:[%s2669_s5] sm:$0xff] %vm753_vm2, %v1013_v13  ;;  %v1786_v21 = vpop.f32.mrb[2].mxu1 }
 0x1c0   :  { %v1028_v22 = vadd.f32 %v1786_v21, %v2342_v17  ;;  %v1022_v23 = vpop.f32.mrb[3].mxu1 }
 0x1c1   :  { %v1023_v24 = vadd.f32 %v2342_v17, %v1022_v23 }
 0x1c2   :  { %1334 = vst.msk [vmem:[%s2669_s5 + $0x18] sm:$0xff] %vm753_vm2, %v1028_v22 }
 0x1c3   :  { %1333 = vst.msk [vmem:[%s2669_s5 + $0x10] sm:$0xff] %vm753_vm2, %v1023_v24  ;;  %v1789_v25 = vpop.f32.mrb[4].mxu1 }
 0x1c4   :  { %v1038_v26 = vadd.f32 %v1789_v25, %v2342_v17  ;;  %v1032_v27 = vpop.f32.mrb[5].mxu1 }
 0x1c5   :  { %v1033_v28 = vadd.f32 %v2342_v17, %v1032_v27 }
 0x1c6   :  { %1336 = vst.msk [vmem:[%s2669_s5 + $0x28] sm:$0xff] %vm753_vm2, %v1038_v26 }
 0x1c7   :  { %1335 = vst.msk [vmem:[%s2669_s5 + $0x20] sm:$0xff] %vm753_vm2, %v1033_v28  ;;  %v1792_v29 = vpop.f32.mrb[6].mxu1 }
 0x1c8   :  { %v1048_v30 = vadd.f32 %v1792_v29, %v2342_v17  ;;  %v1042_v31 = vpop.f32.mrb[7].mxu1 }
 0x1c9   :  { %v1043_v32 = vadd.f32 %v2342_v17, %v1042_v31 }
 0x1ca   :  { %1338 = vst.msk [vmem:[%s2669_s5 + $0x38] sm:$0xff] %vm753_vm2, %v1048_v30 }
 0x1cb   :  { %1337 = vst.msk [vmem:[%s2669_s5 + $0x30] sm:$0xff] %vm753_vm2, %v1043_v32  ;;  %v1795_v33 = vpop.f32.mrb[8].mxu1 }
 0x1cc   :  { %v1058_v34 = vadd.f32 %v1795_v33, %v2342_v17  ;;  %v1052_v35 = vpop.f32.mrb[9].mxu1 }
 0x1cd   :  { %v1053_v36 = vadd.f32 %v2342_v17, %v1052_v35 }
 0x1ce   :  { %1340 = vst.msk [vmem:[%s2669_s5 + $0x48] sm:$0xff] %vm753_vm2, %v1058_v34 }
 0x1cf   :  { %1339 = vst.msk [vmem:[%s2669_s5 + $0x40] sm:$0xff] %vm753_vm2, %v1053_v36  ;;  %v1798_v37 = vpop.f32.mrb[10].mxu1 }
 0x1d0   :  { %v1068_v38 = vadd.f32 %v1798_v37, %v2342_v17  ;;  %v1062_v39 = vpop.f32.mrb[11].mxu1 }
 0x1d1   :  { %v1063_v40 = vadd.f32 %v2342_v17, %v1062_v39 }
 0x1d2   :  { %1342 = vst.msk [vmem:[%s2669_s5 + $0x58] sm:$0xff] %vm753_vm2, %v1068_v38 }
 0x1d3   :  { %1341 = vst.msk [vmem:[%s2669_s5 + $0x50] sm:$0xff] %vm753_vm2, %v1063_v40  ;;  %v1801_v41 = vpop.f32.mrb[12].mxu1 }
 0x1d4   :  { %v1078_v42 = vadd.f32 %v1801_v41, %v2342_v17  ;;  %v1072_v43 = vpop.f32.mrb[13].mxu1 }
 0x1d5   :  { %v1073_v44 = vadd.f32 %v2342_v17, %v1072_v43 }
 0x1d6   :  { %1344 = vst.msk [vmem:[%s2669_s5 + $0x68] sm:$0xff] %vm753_vm2, %v1078_v42 }
 0x1d7   :  { %1343 = vst.msk [vmem:[%s2669_s5 + $0x60] sm:$0xff] %vm753_vm2, %v1073_v44  ;;  %v1804_v45 = vpop.f32.mrb[14].mxu1 }
 0x1d8   :  { %v1088_v46 = vadd.f32 %v1804_v45, %v2342_v17  ;;  %v1082_v47 = vpop.f32.mrb[15].mxu1 }
 0x1d9   :  { %v1083_v48 = vadd.f32 %v2342_v17, %v1082_v47 }
 0x1da   :  { %1346 = vst.msk [vmem:[%s2669_s5 + $0x78] sm:$0xff] %vm753_vm2, %v1088_v46 }
 0x1db   :  { %1345 = vst.msk [vmem:[%s2669_s5 + $0x70] sm:$0xff] %vm753_vm2, %v1083_v48  ;;  %v1807_v49 = vpop.f32.mrb[16].mxu1 }
 0x1dc   :  { %v1098_v50 = vadd.f32 %v1807_v49, %v2342_v17  ;;  %v1092_v51 = vpop.f32.mrb[17].mxu1 }
 0x1dd   :  { %v1093_v52 = vadd.f32 %v2342_v17, %v1092_v51 }
 0x1de   :  { %1348 = vst.msk [vmem:[%s2669_s5 + $0x88] sm:$0xff] %vm753_vm2, %v1098_v50 }
 0x1df   :  { %1347 = vst.msk [vmem:[%s2669_s5 + $0x80] sm:$0xff] %vm753_vm2, %v1093_v52  ;;  %v1810_v53 = vpop.f32.mrb[18].mxu1 }
 0x1e0   :  { %v1108_v54 = vadd.f32 %v1810_v53, %v2342_v17  ;;  %v1102_v55 = vpop.f32.mrb[19].mxu1 }
 0x1e1   :  { %v1103_v56 = vadd.f32 %v2342_v17, %v1102_v55 }
 0x1e2   :  { %1350 = vst.msk [vmem:[%s2669_s5 + $0x98] sm:$0xff] %vm753_vm2, %v1108_v54 }
 0x1e3   :  { %1349 = vst.msk [vmem:[%s2669_s5 + $0x90] sm:$0xff] %vm753_vm2, %v1103_v56  ;;  %v1813_v57 = vpop.f32.mrb[20].mxu1 }
 0x1e4   :  { %v1118_v58 = vadd.f32 %v1813_v57, %v2342_v17  ;;  %v1112_v59 = vpop.f32.mrb[21].mxu1 }
 0x1e5   :  { %v1113_v60 = vadd.f32 %v2342_v17, %v1112_v59 }
 0x1e6   :  { %1352 = vst.msk [vmem:[%s2669_s5 + $0xa8] sm:$0xff] %vm753_vm2, %v1118_v58 }
 0x1e7   :  { %1351 = vst.msk [vmem:[%s2669_s5 + $0xa0] sm:$0xff] %vm753_vm2, %v1113_v60  ;;  %v1816_v61 = vpop.f32.mrb[22].mxu1 }
 0x1e8   :  { %v1128_v62 = vadd.f32 %v1816_v61, %v2342_v17  ;;  %v1122_v63 = vpop.f32.mrb[23].mxu1 }
 0x1e9   :  { %v1123_v0 = vadd.f32 %v2342_v17, %v1122_v63 }
 0x1ea   :  { %1354 = vst.msk [vmem:[%s2669_s5 + $0xb8] sm:$0xff] %vm753_vm2, %v1128_v62 }
 0x1eb   :  { %1353 = vst.msk [vmem:[%s2669_s5 + $0xb0] sm:$0xff] %vm753_vm2, %v1123_v0  ;;  %v1819_v1 = vpop.f32.mrb[24].mxu1 }
 0x1ec   :  { %v1138_v2 = vadd.f32 %v1819_v1, %v2342_v17  ;;  %v1132_v3 = vpop.f32.mrb[25].mxu1 }
 0x1ed   :  { %v1133_v4 = vadd.f32 %v2342_v17, %v1132_v3 }
 0x1ee   :  { %1356 = vst.msk [vmem:[%s2669_s5 + $0xc8] sm:$0xff] %vm753_vm2, %v1138_v2 }
 0x1ef   :  { %1355 = vst.msk [vmem:[%s2669_s5 + $0xc0] sm:$0xff] %vm753_vm2, %v1133_v4  ;;  %v1822_v5 = vpop.f32.mrb[26].mxu1 }
 0x1f0   :  { %v1148_v6 = vadd.f32 %v1822_v5, %v2342_v17  ;;  %v1142_v7 = vpop.f32.mrb[27].mxu1 }
 0x1f1   :  { %v1143_v8 = vadd.f32 %v2342_v17, %v1142_v7 }
 0x1f2   :  { %1358 = vst.msk [vmem:[%s2669_s5 + $0xd8] sm:$0xff] %vm753_vm2, %v1148_v6 }
 0x1f3   :  { %1357 = vst.msk [vmem:[%s2669_s5 + $0xd0] sm:$0xff] %vm753_vm2, %v1143_v8  ;;  %v1825_v9 = vpop.f32.mrb[28].mxu1 }
 0x1f4   :  { %v1158_v10 = vadd.f32 %v1825_v9, %v2342_v17  ;;  %v1152_v11 = vpop.f32.mrb[29].mxu1 }
 0x1f5   :  { %v1153_v12 = vadd.f32 %v2342_v17, %v1152_v11 }
 0x1f6   :  { %1360 = vst.msk [vmem:[%s2669_s5 + $0xe8] sm:$0xff] %vm753_vm2, %v1158_v10 }
 0x1f7   :  { %1359 = vst.msk [vmem:[%s2669_s5 + $0xe0] sm:$0xff] %vm753_vm2, %v1153_v12  ;;  %v1828_v14 = vpop.f32.mrb[30].mxu1 }
 0x1f8   :  { %v1168_v15 = vadd.f32 %v1828_v14, %v2342_v17  ;;  %v1162_v16 = vpop.f32.mrb[31].mxu1 }
 0x1f9   :  { %v1163_v18 = vadd.f32 %v2342_v17, %v1162_v16 }
 0x1fa   :  { %1362 = vst.msk [vmem:[%s2669_s5 + $0xf8] sm:$0xff] %vm753_vm2, %v1168_v15 }
 0x1fb   :  { %1361 = vst.msk [vmem:[%s2669_s5 + $0xf0] sm:$0xff] %vm753_vm2, %v1163_v18  ;;  %v1831_v19 = vpop.f32.mrb[32].mxu1 }
 0x1fc   :  { %v1178_v20 = vadd.f32 %v1831_v19, %v2342_v17  ;;  %v1172_v13 = vpop.f32.mrb[33].mxu1 }
 0x1fd   :  { %v1173_v21 = vadd.f32 %v2342_v17, %v1172_v13 }
 0x1fe   :  { %1364 = vst.msk [vmem:[%s2669_s5 + $0x108] sm:$0xff] %vm753_vm2, %v1178_v20 }
 0x1ff   :  { %1363 = vst.msk [vmem:[%s2669_s5 + $0x100] sm:$0xff] %vm753_vm2, %v1173_v21  ;;  %v1834_v22 = vpop.f32.mrb[34].mxu1 }
 0x200   :  { %v1188_v23 = vadd.f32 %v1834_v22, %v2342_v17  ;;  %v1182_v24 = vpop.f32.mrb[35].mxu1 }
 0x201   :  { %v1183_v25 = vadd.f32 %v2342_v17, %v1182_v24 }
 0x202   :  { %1366 = vst.msk [vmem:[%s2669_s5 + $0x118] sm:$0xff] %vm753_vm2, %v1188_v23 }
 0x203   :  { %1365 = vst.msk [vmem:[%s2669_s5 + $0x110] sm:$0xff] %vm753_vm2, %v1183_v25  ;;  %v1837_v26 = vpop.f32.mrb[36].mxu1 }
 0x204   :  { %v1198_v27 = vadd.f32 %v1837_v26, %v2342_v17  ;;  %v1192_v28 = vpop.f32.mrb[37].mxu1 }
 0x205   :  { %v1193_v29 = vadd.f32 %v2342_v17, %v1192_v28 }
 0x206   :  { %1368 = vst.msk [vmem:[%s2669_s5 + $0x128] sm:$0xff] %vm753_vm2, %v1198_v27 }
 0x207   :  { %1367 = vst.msk [vmem:[%s2669_s5 + $0x120] sm:$0xff] %vm753_vm2, %v1193_v29  ;;  %v1840_v30 = vpop.f32.mrb[38].mxu1 }
 0x208   :  { %v1208_v31 = vadd.f32 %v1840_v30, %v2342_v17  ;;  %v1202_v32 = vpop.f32.mrb[39].mxu1 }
 0x209   :  { %v1203_v33 = vadd.f32 %v2342_v17, %v1202_v32 }
 0x20a   :  { %1370 = vst.msk [vmem:[%s2669_s5 + $0x138] sm:$0xff] %vm753_vm2, %v1208_v31 }
 0x20b   :  { %1369 = vst.msk [vmem:[%s2669_s5 + $0x130] sm:$0xff] %vm753_vm2, %v1203_v33  ;;  %v1843_v34 = vpop.f32.mrb[40].mxu1 }
 0x20c   :  { %v1218_v35 = vadd.f32 %v1843_v34, %v2342_v17  ;;  %v1212_v36 = vpop.f32.mrb[41].mxu1 }
 0x20d   :  { %v1213_v37 = vadd.f32 %v2342_v17, %v1212_v36 }
 0x20e   :  { %1372 = vst.msk [vmem:[%s2669_s5 + $0x148] sm:$0xff] %vm753_vm2, %v1218_v35 }
 0x20f   :  { %1371 = vst.msk [vmem:[%s2669_s5 + $0x140] sm:$0xff] %vm753_vm2, %v1213_v37  ;;  %v1846_v38 = vpop.f32.mrb[42].mxu1 }
 0x210   :  { %v1228_v39 = vadd.f32 %v1846_v38, %v2342_v17  ;;  %v1222_v40 = vpop.f32.mrb[43].mxu1 }
 0x211   :  { %v1223_v41 = vadd.f32 %v2342_v17, %v1222_v40 }
 0x212   :  { %1374 = vst.msk [vmem:[%s2669_s5 + $0x158] sm:$0xff] %vm753_vm2, %v1228_v39 }
 0x213   :  { %1373 = vst.msk [vmem:[%s2669_s5 + $0x150] sm:$0xff] %vm753_vm2, %v1223_v41  ;;  %v1849_v42 = vpop.f32.mrb[44].mxu1 }
 0x214   :  { %v1238_v43 = vadd.f32 %v1849_v42, %v2342_v17  ;;  %v1232_v44 = vpop.f32.mrb[45].mxu1 }
 0x215   :  { %v1233_v45 = vadd.f32 %v2342_v17, %v1232_v44 }
 0x216   :  { %1376 = vst.msk [vmem:[%s2669_s5 + $0x168] sm:$0xff] %vm753_vm2, %v1238_v43 }
 0x217   :  { %1375 = vst.msk [vmem:[%s2669_s5 + $0x160] sm:$0xff] %vm753_vm2, %v1233_v45  ;;  %v1852_v46 = vpop.f32.mrb[46].mxu1 }
 0x218   :  { %v1248_v47 = vadd.f32 %v1852_v46, %v2342_v17  ;;  %v1242_v48 = vpop.f32.mrb[47].mxu1 }
 0x219   :  { %v1243_v49 = vadd.f32 %v2342_v17, %v1242_v48 }
 0x21a   :  { %1378 = vst.msk [vmem:[%s2669_s5 + $0x178] sm:$0xff] %vm753_vm2, %v1248_v47 }
 0x21b   :  { %1377 = vst.msk [vmem:[%s2669_s5 + $0x170] sm:$0xff] %vm753_vm2, %v1243_v49  ;;  %v1855_v50 = vpop.f32.mrb[48].mxu1 }
 0x21c   :  { %v1258_v51 = vadd.f32 %v1855_v50, %v2342_v17  ;;  %v1252_v52 = vpop.f32.mrb[49].mxu1 }
 0x21d   :  { %v1253_v53 = vadd.f32 %v2342_v17, %v1252_v52 }
 0x21e   :  { %1380 = vst.msk [vmem:[%s2669_s5 + $0x188] sm:$0xff] %vm753_vm2, %v1258_v51 }
 0x21f   :  { %1379 = vst.msk [vmem:[%s2669_s5 + $0x180] sm:$0xff] %vm753_vm2, %v1253_v53  ;;  %v1858_v54 = vpop.f32.mrb[50].mxu1 }
 0x220   :  { %v1268_v55 = vadd.f32 %v1858_v54, %v2342_v17  ;;  %v1262_v56 = vpop.f32.mrb[51].mxu1 }
 0x221   :  { %v1263_v57 = vadd.f32 %v2342_v17, %v1262_v56 }
 0x222   :  { %1382 = vst.msk [vmem:[%s2669_s5 + $0x198] sm:$0xff] %vm753_vm2, %v1268_v55 }
 0x223   :  { %1381 = vst.msk [vmem:[%s2669_s5 + $0x190] sm:$0xff] %vm753_vm2, %v1263_v57  ;;  %v1861_v58 = vpop.f32.mrb[52].mxu1 }
 0x224   :  { %v1278_v59 = vadd.f32 %v1861_v58, %v2342_v17  ;;  %v1272_v60 = vpop.f32.mrb[53].mxu1 }
 0x225   :  { %v1273_v61 = vadd.f32 %v2342_v17, %v1272_v60 }
 0x226   :  { %1384 = vst.msk [vmem:[%s2669_s5 + $0x1a8] sm:$0xff] %vm753_vm2, %v1278_v59 }
 0x227   :  { %1383 = vst.msk [vmem:[%s2669_s5 + $0x1a0] sm:$0xff] %vm753_vm2, %v1273_v61  ;;  %v1864_v62 = vpop.f32.mrb[54].mxu1 }
 0x228   :  { %v1288_v63 = vadd.f32 %v1864_v62, %v2342_v17  ;;  %v1282_v0 = vpop.f32.mrb[55].mxu1 }
 0x229   :  { %v1283_v1 = vadd.f32 %v2342_v17, %v1282_v0 }
 0x22a   :  { %1386 = vst.msk [vmem:[%s2669_s5 + $0x1b8] sm:$0xff] %vm753_vm2, %v1288_v63 }
 0x22b   :  { %1385 = vst.msk [vmem:[%s2669_s5 + $0x1b0] sm:$0xff] %vm753_vm2, %v1283_v1  ;;  %v1867_v2 = vpop.f32.mrb[56].mxu1 }
 0x22c   :  { %v1298_v3 = vadd.f32 %v1867_v2, %v2342_v17  ;;  %v1292_v4 = vpop.f32.mrb[57].mxu1 }
 0x22d   :  { %v1293_v5 = vadd.f32 %v2342_v17, %v1292_v4 }
 0x22e   :  { %1388 = vst.msk [vmem:[%s2669_s5 + $0x1c8] sm:$0xff] %vm753_vm2, %v1298_v3 }
 0x22f   :  { %1387 = vst.msk [vmem:[%s2669_s5 + $0x1c0] sm:$0xff] %vm753_vm2, %v1293_v5  ;;  %v1870_v6 = vpop.f32.mrb[58].mxu1 }
 0x230   :  { %v1308_v7 = vadd.f32 %v1870_v6, %v2342_v17  ;;  %v1302_v8 = vpop.f32.mrb[59].mxu1 }
 0x231   :  { %v1303_v9 = vadd.f32 %v2342_v17, %v1302_v8 }
 0x232   :  { %1390 = vst.msk [vmem:[%s2669_s5 + $0x1d8] sm:$0xff] %vm753_vm2, %v1308_v7 }
 0x233   :  { %1389 = vst.msk [vmem:[%s2669_s5 + $0x1d0] sm:$0xff] %vm753_vm2, %v1303_v9  ;;  %v1873_v10 = vpop.f32.mrb[60].mxu1 }
 0x234   :  { %v1318_v11 = vadd.f32 %v1873_v10, %v2342_v17  ;;  %v1312_v12 = vpop.f32.mrb[61].mxu1 }
 0x235   :  { %v1313_v14 = vadd.f32 %v2342_v17, %v1312_v12 }
 0x236   :  { %1392 = vst.msk [vmem:[%s2669_s5 + $0x1e8] sm:$0xff] %vm753_vm2, %v1318_v11 }
 0x237   :  { %1391 = vst.msk [vmem:[%s2669_s5 + $0x1e0] sm:$0xff] %vm753_vm2, %v1313_v14  ;;  %v1876_v15 = vpop.f32.mrb[62].mxu1 }
 0x238   :  { %v1328_v16 = vadd.f32 %v1876_v15, %v2342_v17  ;;  %v1322_v18 = vpop.f32.mrb[63].mxu1 }
 0x239   :  { %v1323_v19 = vadd.f32 %v2342_v17, %v1322_v18 }
 0x23a   :  { %1394 = vst.msk [vmem:[%s2669_s5 + $0x1f8] sm:$0xff] %vm753_vm2, %v1328_v16 }
 0x23b   :  { %1393 = vst.msk [vmem:[%s2669_s5 + $0x1f0] sm:$0xff] %vm753_vm2, %v1323_v19 }

</bundles_post_ra>
